<compile_context>
chip_gen: v5e
topology: v5e:2x2
jax: 0.10.0
libtpu: 0.0.40
codegen_flags: <defaults>
</compile_context>

<pallas_src>
import jax
import jax.numpy as jnp
from jax import lax
from jax.experimental import pallas as pl
from jax.experimental.pallas import tpu as pltpu

IN_FEATURES = 15
HIDDEN_DIM = 32          # config['hidden_dim'] (synthetic choice)
LANE = 128
MAX_TILE_B = 8192        # ~512 KiB/f32 x-tile (16x8192x4) -> safe even on v7x VMEM


# ----------------------------- Pallas kernel ------------------------------- #

def _lbbnn_fwd_kernel(xt_ref, w1_ref, b1c_ref, w2c_ref, b2_ref, out_ref):
    """One batch tile, batch on the lane axis.

    xt_ref : (IN_FEATURES, TILE_B)   activations (transposed)
    w1_ref : (HIDDEN_DIM, IN_FEATURES)  assembled layer-1 weight (torch layout)
    b1c_ref: (HIDDEN_DIM, 1)            layer-1 bias as a column
    w2c_ref: (HIDDEN_DIM, 1)            assembled layer-2 weight as a column
    b2_ref : (1, 1)                     layer-2 bias
    out_ref: (1, TILE_B)                sigmoid output, lane-dense
    """
    # Layer 1 on the MXU: canonical (M,K)x(K,N) = (32,15)x(15,TILE_B).
    h = lax.dot_general(w1_ref[...], xt_ref[...],
                        (((1,), (0,)), ((), ())),
                        preferred_element_type=jnp.float32)
    h = jnp.maximum(h + b1c_ref[...], 0.0)                 # ReLU, (32, TILE_B)

    # Layer 2 has N=1: VPU multiply + sublane reduce (no degenerate MXU pass),
    # result stays lane-dense as (1, TILE_B).
    y = jnp.sum(h * w2c_ref[...], axis=0, keepdims=True) + b2_ref[...]
    out_ref[...] = jax.nn.sigmoid(y)


# ------------------------------- wrapper ----------------------------------- #

def _round_up(n, m):
    return ((n + m - 1) // m) * m


def init_params(key):
    """Deterministic init mirroring the torch __init__ shapes/ranges."""
    ks = jax.random.split(key, 10)
    u = lambda k, shape, lo, hi: jax.random.uniform(k, shape, jnp.float32, lo, hi)
    return {
        # layer 1: BayesianLinear(15, dim)
        "wmu1":  u(ks[0], (HIDDEN_DIM, IN_FEATURES), -0.2, 0.2),
        "wrho1": u(ks[1], (HIDDEN_DIM, IN_FEATURES), -5.0, -4.0),
        "lam1":  u(ks[2], (HIDDEN_DIM, IN_FEATURES), -10.0, 10.0),
        "bmu1":  u(ks[3], (1, HIDDEN_DIM), -0.2, 0.2),
        "brho1": u(ks[4], (1, HIDDEN_DIM), -5.0, -4.0),
        # layer 2: BayesianLinear(dim, 1)
        "wmu2":  u(ks[5], (1, HIDDEN_DIM), -0.2, 0.2),
        "wrho2": u(ks[6], (1, HIDDEN_DIM), -5.0, -4.0),
        "lam2":  u(ks[7], (1, HIDDEN_DIM), -10.0, 10.0),
        "bmu2":  u(ks[8], (1, 1), -0.2, 0.2),
        "brho2": u(ks[9], (1, 1), -5.0, -4.0),
    }


def _assemble_weights(params, g1, g2, sample, key):
    """Hoisted (x-independent) weight construction, done once in the wrapper."""
    if sample:
        k1, k2, k3, k4 = jax.random.split(key, 4)
        eps_w1 = jax.random.normal(k1, params["wmu1"].shape, jnp.float32)
        eps_b1 = jax.random.normal(k2, params["bmu1"].shape, jnp.float32)
        eps_w2 = jax.random.normal(k3, params["wmu2"].shape, jnp.float32)
        eps_b2 = jax.random.normal(k4, params["bmu2"].shape, jnp.float32)
        w1 = jnp.asarray(g1, jnp.float32) * (
            params["wmu1"] + jax.nn.softplus(params["wrho1"]) * eps_w1)
        b1 = params["bmu1"] + jax.nn.softplus(params["brho1"]) * eps_b1
        w2 = jnp.asarray(g2, jnp.float32) * (
            params["wmu2"] + jax.nn.softplus(params["wrho2"]) * eps_w2)
        b2 = params["bmu2"] + jax.nn.softplus(params["brho2"]) * eps_b2
    else:
        w1 = jax.nn.sigmoid(params["lam1"]) * params["wmu1"]
        b1 = params["bmu1"]
        w2 = jax.nn.sigmoid(params["lam2"]) * params["wmu2"]
        b2 = params["bmu2"]
    return w1, b1, w2, b2


def bayesian_network_forward(params, x, g1, g2, sample=False, key=None):
    """Pallas implementation of BayesianNetwork.forward(x, g1, g2, sample)."""
    x = jnp.asarray(x, jnp.float32).reshape(-1, IN_FEATURES)   # x.view(-1, 15)
    batch = x.shape[0]
    if sample:
        assert key is not None

    w1, b1, w2, b2 = _assemble_weights(params, g1, g2, sample, key)
    b1c = b1.reshape(HIDDEN_DIM, 1)        # column layouts for lane-broadcast
    w2c = w2.reshape(HIDDEN_DIM, 1)
    b2s = b2.reshape(1, 1)

    # Batch tiling: batch lives on the lane axis, tile must be a multiple of 128.
    tile_b = min(MAX_TILE_B, _round_up(max(batch, 1), LANE))
    padded_b = _round_up(max(batch, 1), tile_b)
    grid = (padded_b // tile_b,)

    # Lane-dense activation slab (15, padded_b); padded columns are zeros.
    xt = jnp.pad(x, ((0, padded_b - batch), (0, 0))).T

    out = pl.pallas_call(
        _lbbnn_fwd_kernel,
        out_shape=jax.ShapeDtypeStruct((1, padded_b), jnp.float32),
        grid=grid,
        in_specs=[
            pl.BlockSpec((IN_FEATURES, tile_b), lambda i: (0, i)),   # x tile
            pl.BlockSpec((HIDDEN_DIM, IN_FEATURES), lambda i: (0, 0)),  # W1 resident
            pl.BlockSpec((HIDDEN_DIM, 1), lambda i: (0, 0)),            # b1 resident
            pl.BlockSpec((HIDDEN_DIM, 1), lambda i: (0, 0)),            # W2 resident
            pl.BlockSpec((1, 1), lambda i: (0, 0)),                     # b2 resident
        ],
        out_specs=pl.BlockSpec((1, tile_b), lambda i: (0, i)),
        compiler_params=pltpu.CompilerParams(
            dimension_semantics=("parallel",)),
    )(xt, w1, b1c, w2c, b2s)

    return out[0, :batch].reshape(batch, 1)


# --------------------------- pure-JAX reference ----------------------------- #

def _reference_forward(params, x, g1, g2, sample, key):
    x = jnp.asarray(x, jnp.float32).reshape(-1, IN_FEATURES)
    w1, b1, w2, b2 = _assemble_weights(params, g1, g2, sample, key)
    h = jnp.maximum(x @ w1.T + b1, 0.0)
    return jax.nn.sigmoid(h @ w2.T + b2)


# -------------------------------- main -------------------------------------- #

if __name__ == "__main__":
    key = jax.random.PRNGKey(0)
    kp, kx, kg1, kg2, keps = jax.random.split(key, 5)

    params = init_params(kp)

    batch = 16
    x = jax.random.normal(kx, (batch, IN_FEATURES), jnp.float32)

    # gamma samples (as produced by self.lX.gamma.rsample() in sample_elbo)
    alpha1 = jax.nn.sigmoid(params["lam1"])
    alpha2 = jax.nn.sigmoid(params["lam2"])
    g1 = jax.random.bernoulli(kg1, alpha1).astype(jnp.float32)
    g2 = jax.random.bernoulli(kg2, alpha2).astype(jnp.float32)

    out_sample = bayesian_network_forward(params, x, g1, g2, sample=True, key=keps)
    out_mean = bayesian_network_forward(params, x, g1, g2, sample=False)
    jax.block_until_ready((out_sample, out_mean))

    ref_sample = _reference_forward(params, x, g1, g2, True, keps)
    ref_mean = _reference_forward(params, x, g1, g2, False, None)

    assert out_sample.shape == (batch, 1) and out_mean.shape == (batch, 1)
    assert bool(jnp.all((out_sample >= 0.0) & (out_sample <= 1.0)))
    assert bool(jnp.allclose(out_sample, ref_sample, atol=2e-5, rtol=2e-5))
    assert bool(jnp.allclose(out_mean, ref_mean, atol=2e-5, rtol=2e-5))
    print("KERNEL_OK")
</pallas_src>

<mosaic_0001>
module attributes {stable_mosaic.version = 11 : i64} {
  func.func @_lbbnn_fwd_kernel(%arg0: i32, %arg1: memref<15x128xf32, #tpu.memory_space<vmem>>, %arg2: memref<32x15xf32, #tpu.memory_space<vmem>>, %arg3: memref<32x1xf32, #tpu.memory_space<vmem>>, %arg4: memref<32x1xf32, #tpu.memory_space<vmem>>, %arg5: memref<1x1xf32, #tpu.memory_space<vmem>>, %arg6: memref<1x128xf32, #tpu.memory_space<vmem>>) attributes {dimension_semantics = [#tpu.dimension_semantics<parallel>], iteration_bounds = array<i64: 1>, scalar_prefetch = 0 : i64, scratch_operands = 0 : i64, tpu.core_type = #tpu.core_type<tc>, window_params = [{transform_indices = @transform_0, window_bounds = array<i64: 15, 128>}, {pipeline_mode = #tpu.pipeline_mode<synchronous>, transform_indices = @transform_1, window_bounds = array<i64: 32, 15>}, {pipeline_mode = #tpu.pipeline_mode<synchronous>, transform_indices = @transform_2, window_bounds = array<i64: 32, 1>}, {pipeline_mode = #tpu.pipeline_mode<synchronous>, transform_indices = @transform_3, window_bounds = array<i64: 32, 1>}, {pipeline_mode = #tpu.pipeline_mode<synchronous>, transform_indices = @transform_4, window_bounds = array<i64: 1, 1>}, {transform_indices = @transform_5, window_bounds = array<i64: 1, 128>}]} {
    %c0 = arith.constant 0 : index
    %c0_0 = arith.constant 0 : index
    %0 = vector.load %arg2[%c0, %c0_0] : memref<32x15xf32, #tpu.memory_space<vmem>>, vector<32x15xf32>
    %c0_1 = arith.constant 0 : index
    %c0_2 = arith.constant 0 : index
    %1 = vector.load %arg1[%c0_1, %c0_2] : memref<15x128xf32, #tpu.memory_space<vmem>>, vector<15x128xf32>
    %cst = arith.constant dense<0.000000e+00> : vector<32x128xf32>
    %2 = tpu.matmul %0, %1, %cst {dimension_numbers = #tpu.dot_dimension_numbers<[1], [0], [0], [1], [0, 0, 1, 1], [], []>} : vector<32x15xf32>, vector<15x128xf32>, vector<32x128xf32> -> vector<32x128xf32>
    %c0_3 = arith.constant 0 : index
    %c0_4 = arith.constant 0 : index
    %3 = vector.load %arg3[%c0_3, %c0_4] : memref<32x1xf32, #tpu.memory_space<vmem>>, vector<32x1xf32>
    %4 = vector.broadcast %3 : vector<32x1xf32> to vector<32x128xf32>
    %5 = arith.addf %2, %4 : vector<32x128xf32>
    %cst_5 = arith.constant 0.000000e+00 : f32
    %6 = vector.broadcast %cst_5 : f32 to vector<32x128xf32>
    %7 = arith.maximumf %5, %6 : vector<32x128xf32>
    %c0_6 = arith.constant 0 : index
    %c0_7 = arith.constant 0 : index
    %8 = vector.load %arg4[%c0_6, %c0_7] : memref<32x1xf32, #tpu.memory_space<vmem>>, vector<32x1xf32>
    %9 = vector.broadcast %8 : vector<32x1xf32> to vector<32x128xf32>
    %10 = arith.mulf %7, %9 : vector<32x128xf32>
    %cst_8 = arith.constant dense<0.000000e+00> : vector<128xf32>
    %11 = vector.multi_reduction <add>, %10, %cst_8 [0] : vector<32x128xf32> to vector<128xf32>
    %12 = vector.shape_cast %11 : vector<128xf32> to vector<1x128xf32>
    %c0_9 = arith.constant 0 : index
    %c0_10 = arith.constant 0 : index
    %13 = vector.load %arg5[%c0_9, %c0_10] : memref<1x1xf32, #tpu.memory_space<vmem>>, vector<1x1xf32>
    %14 = vector.broadcast %13 : vector<1x1xf32> to vector<1x128xf32>
    %15 = arith.addf %12, %14 : vector<1x128xf32>
    %16 = arith.negf %15 : vector<1x128xf32>
    %17 = math.exp %16 : vector<1x128xf32>
    %cst_11 = arith.constant 1.000000e+00 : f32
    %18 = vector.broadcast %cst_11 : f32 to vector<1x128xf32>
    %19 = arith.addf %18, %17 : vector<1x128xf32>
    %20 = arith.divf %18, %19 : vector<1x128xf32>
    %c0_12 = arith.constant 0 : index
    %c0_13 = arith.constant 0 : index
    %21 = vector.load %arg6[%c0_12, %c0_13] : memref<1x128xf32, #tpu.memory_space<vmem>>, vector<1x128xf32>
    tpu.vector_store %arg6[%c0_12, %c0_13], %20 {strides = array<i32>} : memref<1x128xf32, #tpu.memory_space<vmem>>, vector<1x128xf32>,
    return
  }
  func.func @transform_0(%arg0: i32) -> (i32, i32) {
    %c0_i32 = arith.constant 0 : i32
    %c0_i32_0 = arith.constant 0 : i32
    return %c0_i32, %arg0 : i32, i32
  }
  func.func @transform_1(%arg0: i32) -> (i32, i32) {
    %c0_i32 = arith.constant 0 : i32
    %c0_i32_0 = arith.constant 0 : i32
    %c0_i32_1 = arith.constant 0 : i32
    return %c0_i32, %c0_i32_0 : i32, i32
  }
  func.func @transform_2(%arg0: i32) -> (i32, i32) {
    %c0_i32 = arith.constant 0 : i32
    %c0_i32_0 = arith.constant 0 : i32
    %c0_i32_1 = arith.constant 0 : i32
    return %c0_i32, %c0_i32_0 : i32, i32
  }
  func.func @transform_3(%arg0: i32) -> (i32, i32) {
    %c0_i32 = arith.constant 0 : i32
    %c0_i32_0 = arith.constant 0 : i32
    %c0_i32_1 = arith.constant 0 : i32
    return %c0_i32, %c0_i32_0 : i32, i32
  }
  func.func @transform_4(%arg0: i32) -> (i32, i32) {
    %c0_i32 = arith.constant 0 : i32
    %c0_i32_0 = arith.constant 0 : i32
    %c0_i32_1 = arith.constant 0 : i32
    return %c0_i32, %c0_i32_0 : i32, i32
  }
  func.func @transform_5(%arg0: i32) -> (i32, i32) {
    %c0_i32 = arith.constant 0 : i32
    %c0_i32_0 = arith.constant 0 : i32
    return %c0_i32, %arg0 : i32, i32
  }
}

</mosaic_0001>

<bundles_post_ra>
// kernel: tpu_custom_call.1
= control target key start
LH: loop header
LB: loop body
LE: loop exit
PB: predicated region body
PF: predicated region fallthrough
CT: control target
= control target key end

     0   :  { %s311_s0 = inlined_call_operand.vmem [shape: f32[15,128], index: 0, kind: input, shape index: {}]   ;;  %s312_s1 = inlined_call_operand.vmem [shape: f32[32,15], index: 1, kind: input, shape index: {}]   ;;  %s313_s2 = inlined_call_operand.vmem [shape: f32[32,1], index: 2, kind: input, shape index: {}]   ;;  %s314_s3 = inlined_call_operand.vmem [shape: f32[32,1], index: 3, kind: input, shape index: {}]   ;;  %s315_s4 = inlined_call_operand.<no memory space> [shape: f32[1,1], index: 4, kind: input, shape index: {}]   ;;  %s316_s5 = inlined_call_operand.hbm [shape: f32[1,128], index: 5, kind: output, shape index: {}]  }
   0x1   :  { %v10_v0 = vstv %s315_s4 }
   0x2   :  { %11 = vst [vmem:[#allocation2] sm:$0x1] %v10_v0 }
   0x3   :  { %v28_v1 = vld [vmem:[%s311_s0 + $0x8] sm:$0x7f]  ;;  %vm66_vm0 = vcmask 1046528   ;;  %v231_v2 = vmov 0   ;;  %v31_v3 = vld [vmem:[%s313_s2 + $0x10] sm:$0xff]  ;;  %v29_v4 = vld [vmem:[%s313_s2] sm:$0xff] }
   0x4   :  { %199 = vset.pattern.permute.xlu1 %v231_v2  ;;  %198 = vset.pattern.permute.xlu0 %v231_v2  ;;  %v27_v5 = vld [vmem:[%s311_s0] sm:$0xff]  ;;  %vm53_vm1 = vcmask 121856   ;;  %v24_v7 = vld [vmem:[%s312_s1 + $0x8] sm:$0xff]  ;;  %v25_v8 = vld [vmem:[%s312_s1 + $0x10] sm:$0xff] }
   0x5   :  { %184 = vmatpush.msk.msra.mxu0 %vm66_vm0, %v28_v1  ;;  %190 = vmatpush.msk.msra.mxu1 %vm66_vm0, %v28_v1  ;;  %v23_v6 = vld [vmem:[%s312_s1] sm:$0xff]  ;;  %v26_v9 = vld [vmem:[%s312_s1 + $0x18] sm:$0xff] }
   0x6   :  { %191 = vmatpush.msk.msra.mxu2 %vm66_vm0, %v28_v1  ;;  %192 = vmatpush.msk.msra.mxu3 %vm66_vm0, %v28_v1 }
   0x7   :  { %45 = vperm.xlu1 %199, %v31_v3   ;;  %35 = vperm.xlu0 %198, %v29_v4  }
   0x8   :  { %85 = vmatpush.msra.mxu0 %v27_v5  ;;  %193 = vmatpush.msra.mxu1 %v27_v5 }
   0x9   :  { %12 = vsyncpa [#allocation4], 0  ;;  %194 = vmatpush.msra.mxu2 %v27_v5  ;;  %195 = vmatpush.msra.mxu3 %v27_v5  ;;  %v103_v10 = vld [vmem:[%s314_s3] sm:$0xff]  ;;  %v32_v11 = vld [vmem:[%s313_s2 + $0x18] sm:$0xff]  ;;  %s175_s22 = sshll.u32 %s316_s5, 4  ;;  %s176_s22 = int_to_ptr.hbm [resolvable:$true] %s175_s22 }
   0xa   :  { %185 = vmatmul.msk.f32.vlgmr.msra.gmra.mxu0 %vm53_vm1, %v23_v6  ;;  %186 = vmatmul.msk.f32.vlgmr.msra.gmra.mxu1 %vm53_vm1, %v24_v7  ;;  %v30_v12 = vld [vmem:[%s313_s2 + $0x8] sm:$0xff]  ;;  %v106_v14 = vld [vmem:[%s314_s3 + $0x18] sm:$0xff]  ;;  %v105_v15 = vld [vmem:[%s314_s3 + $0x10] sm:$0xff]  ;;  %s232_s2 = smov [#allocation3]  }
   0xb   :  { %187 = vmatmul.msk.f32.vlgmr.msra.gmra.mxu2 %vm53_vm1, %v25_v8  ;;  %188 = vmatmul.msk.f32.vlgmr.msra.gmra.mxu3 %vm53_vm1, %v26_v9  ;;  %v104_v13 = vld [vmem:[%s314_s3 + $0x8] sm:$0xff]  ;;  %v140_v16 = vld [vmem:[#allocation2] sm:$0x1]  ;;  %s173_s3 = sshll.u32 %s232_s2, 4  ;;  %s174_s3 = int_to_ptr.vmem [resolvable:$true] %s173_s3 }
   0xc   :  { %200 = vset.pattern.permute.xlu2 %v231_v2 }
   0xd   :  { %109 = vperm.xlu2 %200, %v103_v10  }
   0xf   :  { %50 = vperm.xlu1 %199, %v32_v11   ;;  %40 = vperm.xlu0 %198, %v30_v12  }
  0x15   :  { %114 = vperm.xlu2 %200, %v104_v13  }
  0x17   :  { %124 = vperm.xlu1 %199, %v106_v14   ;;  %119 = vperm.xlu0 %198, %v105_v15  }
  0x1d   :  { %143 = vperm.xlu2 %200, %v140_v16  }
  0x67   :  { %v110_v19 = vpop.permute.xlu2 %109 }
  0x6f   :  { %v115_v28 = vpop.permute.xlu2 %114 }
  0x77   :  { %v144_v48 = vpop.permute.xlu2 %143 }
  0x78   :  { %v146_v50 = vperm.slane %v144_v48, 0 }
  0x79   :  { %v36_v17 = vpop.permute.xlu0 %35  ;;  %v46_v18 = vpop.permute.xlu1 %45 }
  0x81   :  { %v41_v20 = vpop.permute.xlu0 %40  ;;  %v51_v25 = vpop.permute.xlu1 %50 }
  0x87   :  { %v87_v21 = vpop.f32.mrf.mxu0  ;;  %v90_v22 = vpop.f32.mrf.mxu1 }
  0x88   :  { %v88_v23 = vadd.f32 %v87_v21, %v36_v17  ;;  %v91_v24 = vadd.f32 %v90_v22, %v41_v20 }
  0x89   :  { %v120_v37 = vpop.permute.xlu0 %119  ;;  %v125_v40 = vpop.permute.xlu1 %124 }
  0x8a   :  { %v99_v26 = vmax.f32 %v88_v23, 0.0  ;;  %v100_v27 = vmax.f32 %v91_v24, 0.0 }
  0x8c   :  { %v127_v31 = vmul.f32 %v110_v19, %v99_v26  ;;  %v128_v32 = vmul.f32 %v115_v28, %v100_v27 }
  0x8e   :  { %v93_v29 = vpop.f32.mrf.mxu2  ;;  %v96_v30 = vpop.f32.mrf.mxu3  ;;  %v131_v38 = vadd.f32 %v128_v32, %v127_v31 }
  0x8f   :  { %v94_v33 = vadd.f32 %v93_v29, %v46_v18  ;;  %v97_v34 = vadd.f32 %v96_v30, %v51_v25 }
  0x91   :  { %v101_v35 = vmax.f32 %v94_v33, 0.0  ;;  %v102_v36 = vmax.f32 %v97_v34, 0.0 }
  0x93   :  { %v129_v39 = vmul.f32 %v120_v37, %v101_v35  ;;  %v130_v42 = vmul.f32 %v125_v40, %v102_v36 }
  0x95   :  { %v132_v41 = vadd.f32 %v131_v38, %v129_v39 }
  0x97   :  { %v133_v43 = vadd.f32 %v132_v41, %v130_v42 }
  0x99   :  { %v134_v44 = vrot.slane %v133_v43, 4 }
  0x9b   :  { %v135_v45 = vadd.f32 %v134_v44, %v133_v43 }
  0x9d   :  { %v136_v46 = vrot.slane %v135_v45, 2 }
  0x9f   :  { %v137_v47 = vadd.f32 %v136_v46, %v135_v45 }
  0xa1   :  { %v138_v49 = vrot.slane %v137_v47, 1 }
  0xa3   :  { %v139_v51 = vadd.f32 %v138_v49, %v137_v47 }
  0xa5   :  { %v147_v52 = vadd.f32 %v146_v50, %v139_v51 }
  0xa7   :  { %v189_v53 = vmul.f32 -1.442695, %v147_v52 }
  0xa9   :  { %201 = vpow2.f32 %v189_v53 }
  0xaf   :  { %v202_v54 = vpop.eup %201 }
  0xb0   :  { %v151_v55 = vadd.f32 1.0, %v202_v54 }
  0xb2   :  { %203 = vrcp.f32 %v151_v55  ;;  %v163_v59 = vand.u32 2147483648, %v151_v55  ;;  %v161_v61 = vand.u32 2147483647, %v151_v55  ;;  %vm157_vm3 = vweird.f32 %v151_v55 }
  0xb4   :  { %v164_v63 = vor.u32 1.1754944e-38, %v163_v59  ;;  %vm162_vm5 = vcmp.eq.f32.partialorder %v161_v61, 8.507059e+37 }
  0xb8   :  { %v204_v56 = vpop.eup %203 }
  0xb9   :  { %v153_v57 = vmul.f32 %v204_v56, %v151_v55  ;;  %vm158_vm2 = vweird.f32 %v204_v56 }
  0xba   :  { %vm159_vm4 = vmor %vm157_vm3, %vm158_vm2 }
  0xbb   :  { %v154_v58 = vsub.f32 1.0, %v153_v57 }
  0xbd   :  { %v155_v60 = vmul.f32 %v204_v56, %v154_v58 }
  0xbf   :  { %v156_v62 = vadd.f32 %v204_v56, %v155_v60 }
  0xc1   :  { %v160_v0 = vsel %vm159_vm4, %v204_v56, %v156_v62 }
  0xc2   :  { %v165_v1 = vsel %vm162_vm5, %v164_v63, %v160_v0 }
  0xc3   :  { %167 = vst [vmem:[#allocation3] sm:$0x1] %v165_v1 }
  0xc4   :  { %178 = dma.vmem_to_hbm [thread:$0]  %s174_s3, 16, %s176_s22, [#allocation4]  }
  0xc5   :  { %229 = dma.done.wait [#allocation4], 16  }
  0xc6   :  { %230 = vsyncadd [#allocation4], 4294967280 }
  0xc7   :  { %183 = vsyncpa [#allocation4], 1 }

</bundles_post_ra>
